<compile_context>
chip_gen: v7x
topology: tpu7x:2x2x1
jax: 0.10.0
libtpu: 0.0.40
codegen_flags: <defaults>
</compile_context>

<pallas_src>
from collections import deque

import numpy as np
import jax
import jax.numpy as jnp
from jax.experimental import pallas as pl
from jax.experimental.pallas import tpu as pltpu


def _round_up(x, m):
    return (x + m - 1) // m * m


# ----------------------------------------------------------------------------
# Pallas kernel: two MXU matmuls, each writing a 128-aligned half of the output
#   out[:, :d2p]  = wsp_tile @ W_wsp + b_wsp
#   out[:, d2p:]  = le_tile  @ W_le  + b_le
# ----------------------------------------------------------------------------
def posenc_kernel(wsp_ref, le_ref, w_wsp_ref, w_le_ref, b_wsp_ref, b_le_ref,
                  out_ref):
    d2p = w_wsp_ref.shape[1]
    acc_wsp = jnp.dot(wsp_ref[...], w_wsp_ref[...],
                      preferred_element_type=jnp.float32)
    acc_le = jnp.dot(le_ref[...], w_le_ref[...],
                     preferred_element_type=jnp.float32)
    out_ref[:, :d2p] = (acc_wsp + b_wsp_ref[...]).astype(out_ref.dtype)
    out_ref[:, d2p:] = (acc_le + b_le_ref[...]).astype(out_ref.dtype)


def graph_bert_positional_encoding(wsp_matrix, le_matrix,
                                   w_wsp, b_wsp, w_le, b_le,
                                   *, out_dtype=jnp.float32):
    """Fused GraphBert positional-encoding projection.

    wsp_matrix, le_matrix : (num_nodes, max_nodes)  f32
    w_wsp, w_le           : (max_nodes, d_model//2) f32  (pre-transposed Linear)
    b_wsp, b_le           : (1, d_model//2)         f32
    returns               : (num_nodes, d_model)    out_dtype
      == concat([wsp @ w_wsp + b_wsp, le @ w_le + b_le], axis=-1)
    """
    n, m = wsp_matrix.shape
    d2 = w_wsp.shape[1]
    d_model = 2 * d2
    d2_pad = _round_up(d2, 128)        # lane-aligned output halves

    # --- lane-pad the (tiny) weights / biases; hoisted/fused under jit -------
    w_wsp_p = jnp.pad(w_wsp.astype(jnp.float32), ((0, 0), (0, d2_pad - d2)))
    w_le_p = jnp.pad(w_le.astype(jnp.float32), ((0, 0), (0, d2_pad - d2)))
    b_wsp_p = jnp.pad(b_wsp.reshape(1, d2).astype(jnp.float32),
                      ((0, 0), (0, d2_pad - d2)))
    b_le_p = jnp.pad(b_le.reshape(1, d2).astype(jnp.float32),
                     ((0, 0), (0, d2_pad - d2)))

    # --- row tiling: VMEM budget includes double-buffered weights + biases ---
    in_itemsize = 4                               # f32 inputs / weights
    out_itemsize = jnp.dtype(out_dtype).itemsize
    vmem_limit = 32 * 1024 * 1024                 # safe scoped limit v5e/v6e/v7x
    # TODO(synk): for extremely large max_nodes the resident weight should be
    # K-tiled (extra "arbitrary" grid axis + f32 accumulator) to bound VMEM on
    # v7x's 64 MiB; not needed for typical graph sizes.
    weight_bytes = 2 * 2 * m * d2_pad * in_itemsize       # 2 weights x 2 buffers
    bias_bytes = 2 * 2 * 1 * d2_pad * in_itemsize
    budget = int(vmem_limit * 0.75) - weight_bytes - bias_bytes
    bytes_per_row = (2 * (2 * m * in_itemsize)             # wsp+le tiles, 2 buffers
                     + 2 * (2 * d2_pad * out_itemsize))    # out tile, 2 buffers
    tile_cap = max(8, (max(budget, 0) // bytes_per_row) // 8 * 8)

    n_rows8 = _round_up(max(n, 1), 8)
    tile_n = int(min(1024, tile_cap, n_rows8))
    # Guarantee >= 2 row tiles when the graph is big enough so the "parallel"
    # axis actually shards across both v7x TensorCores.
    if n_rows8 >= 16 and tile_n * 2 > n_rows8:
        tile_n = _round_up((n_rows8 + 1) // 2, 8)
    tile_n = max(8, tile_n)
    if n <= 8:
        tile_n = n                     # single block equal to full row extent

    grid = (pl.cdiv(n, tile_n),)
    out_padded = pl.pallas_call(
        posenc_kernel,
        out_shape=jax.ShapeDtypeStruct((n, 2 * d2_pad), out_dtype),
        grid=grid,
        in_specs=[
            pl.BlockSpec((tile_n, m), lambda i: (i, 0)),     # wsp rows (pipelined)
            pl.BlockSpec((tile_n, m), lambda i: (i, 0)),     # le rows  (pipelined)
            pl.BlockSpec((m, d2_pad), lambda i: (0, 0)),     # W_wsp (resident)
            pl.BlockSpec((m, d2_pad), lambda i: (0, 0)),     # W_le  (resident)
            pl.BlockSpec((1, d2_pad), lambda i: (0, 0)),     # b_wsp (resident)
            pl.BlockSpec((1, d2_pad), lambda i: (0, 0)),     # b_le  (resident)
        ],
        out_specs=pl.BlockSpec((tile_n, 2 * d2_pad), lambda i: (i, 0)),
        compiler_params=pltpu.CompilerParams(
            dimension_semantics=("parallel",),               # both TCs on v7x
            vmem_limit_bytes=vmem_limit),
    )(wsp_matrix.astype(jnp.float32), le_matrix.astype(jnp.float32),
      w_wsp_p, w_le_p, b_wsp_p, b_le_p)

    if d2_pad == d2:
        # Output halves are already contiguous: no concat needed.
        return out_padded[:, :d_model]
    # Small d_model: strip the lane padding between the two halves.
    return jnp.concatenate(
        [out_padded[:, :d2], out_padded[:, d2_pad:d2_pad + d2]], axis=-1)


# ----------------------------------------------------------------------------
# Host-side graph feature construction (no Pallas equivalent -> numpy)
# ----------------------------------------------------------------------------
# TODO(synk): BFS shortest paths & eigendecomposition are graph/LAPACK ops with
# no clean Pallas equivalent; kept on host (as in the PyTorch reference).
def get_wsp_encoding_np(edge_index, num_nodes, max_nodes):
    adj = [[] for _ in range(num_nodes)]
    for u, v in zip(edge_index[0], edge_index[1]):
        adj[int(u)].append(int(v))
        adj[int(v)].append(int(u))
    spl = np.zeros((num_nodes, max_nodes), dtype=np.float32)
    for src in range(num_nodes):
        dist = np.full(num_nodes, -1, dtype=np.int64)
        dist[src] = 0
        queue = deque([src])
        while queue:
            u = queue.popleft()
            for v in adj[u]:
                if dist[v] < 0:
                    dist[v] = dist[u] + 1
                    queue.append(v)
        for j in range(num_nodes):
            if j == src:
                continue
            path_len = dist[j] if dist[j] >= 0 else max_nodes
            if j < max_nodes:
                spl[src, j] = float(path_len)
    return spl


def get_laplacian_encoding_np(edge_index, num_nodes, max_nodes):
    A = np.zeros((num_nodes, num_nodes), dtype=np.float64)
    for u, v in zip(edge_index[0], edge_index[1]):
        A[int(u), int(v)] = 1.0
        A[int(v), int(u)] = 1.0
    deg = A.sum(axis=1)
    d_inv_sqrt = np.where(deg > 0, 1.0 / np.sqrt(np.maximum(deg, 1e-12)), 0.0)
    # symmetric normalized Laplacian: L = I - D^{-1/2} A D^{-1/2}
    L = np.eye(num_nodes) - (d_inv_sqrt[:, None] * A * d_inv_sqrt[None, :])
    _, eigenvecs = np.linalg.eigh(L)
    padded = np.zeros((num_nodes, max_nodes), dtype=np.float32)
    padded[:, :num_nodes] = eigenvecs.astype(np.float32)
    return padded


# ----------------------------------------------------------------------------
# Main: deterministic params + small example graph
# ----------------------------------------------------------------------------
if __name__ == "__main__":
    d_model = 32
    max_nodes = 16
    num_nodes = 8
    d2 = d_model // 2

    # Deterministic small graph (two connected components -> exercises the
    # "no path -> max_nodes" branch of the WSP encoding).
    edge_index = np.array(
        [[0, 1, 2, 3, 4, 5, 6],
         [1, 2, 3, 0, 5, 6, 7]], dtype=np.int64)

    # Deterministic parameter init (stand-in for nn.Linear weights).
    key = jax.random.PRNGKey(0)
    k1, k2, k3, k4 = jax.random.split(key, 4)
    scale = 1.0 / np.sqrt(max_nodes)
    w_wsp = jax.random.normal(k1, (max_nodes, d2), jnp.float32) * scale
    b_wsp = jax.random.normal(k2, (1, d2), jnp.float32) * scale
    w_le = jax.random.normal(k3, (max_nodes, d2), jnp.float32) * scale
    b_le = jax.random.normal(k4, (1, d2), jnp.float32) * scale

    # Host graph features (same semantics as the PyTorch module's helpers).
    wsp_np = get_wsp_encoding_np(edge_index, num_nodes, max_nodes)
    le_np = get_laplacian_encoding_np(edge_index, num_nodes, max_nodes)
    wsp_matrix = jnp.asarray(wsp_np)
    le_matrix = jnp.asarray(le_np)

    pos_enc = jax.jit(graph_bert_positional_encoding)
    out = pos_enc(wsp_matrix, le_matrix, w_wsp, b_wsp, w_le, b_le)
    out = jax.block_until_ready(out)

    # High-precision host reference of the module's math (f32 params, f64 acc).
    ref_wsp = wsp_np.astype(np.float64) @ np.asarray(w_wsp, np.float64) \
        + np.asarray(b_wsp, np.float64)
    ref_le = le_np.astype(np.float64) @ np.asarray(w_le, np.float64) \
        + np.asarray(b_le, np.float64)
    ref = np.concatenate([ref_wsp, ref_le], axis=-1)

    np.testing.assert_allclose(np.asarray(out, np.float64), ref,
                               rtol=1e-2, atol=1e-2)
    assert out.shape == (num_nodes, d_model)

    print("KERNEL_OK")
</pallas_src>

<mosaic_0001>
module attributes {stable_mosaic.version = 11 : i64} {
  func.func @posenc_kernel(%arg0: i32, %arg1: memref<8x16xf32, #tpu.memory_space<vmem>>, %arg2: memref<8x16xf32, #tpu.memory_space<vmem>>, %arg3: memref<16x128xf32, #tpu.memory_space<vmem>>, %arg4: memref<16x128xf32, #tpu.memory_space<vmem>>, %arg5: memref<1x128xf32, #tpu.memory_space<vmem>>, %arg6: memref<1x128xf32, #tpu.memory_space<vmem>>, %arg7: memref<8x256xf32, #tpu.memory_space<vmem>>) attributes {dimension_semantics = [#tpu.dimension_semantics<parallel>], iteration_bounds = array<i64: 1>, scalar_prefetch = 0 : i64, scratch_operands = 0 : i64, tpu.core_type = #tpu.core_type<tc>, window_params = [{transform_indices = @transform_0, window_bounds = array<i64: 8, 16>}, {transform_indices = @transform_1, window_bounds = array<i64: 8, 16>}, {pipeline_mode = #tpu.pipeline_mode<synchronous>, transform_indices = @transform_2, window_bounds = array<i64: 16, 128>}, {pipeline_mode = #tpu.pipeline_mode<synchronous>, transform_indices = @transform_3, window_bounds = array<i64: 16, 128>}, {pipeline_mode = #tpu.pipeline_mode<synchronous>, transform_indices = @transform_4, window_bounds = array<i64: 1, 128>}, {pipeline_mode = #tpu.pipeline_mode<synchronous>, transform_indices = @transform_5, window_bounds = array<i64: 1, 128>}, {transform_indices = @transform_6, window_bounds = array<i64: 8, 256>}]} {
    %c0 = arith.constant 0 : index
    %c0_0 = arith.constant 0 : index
    %0 = vector.load %arg1[%c0, %c0_0] : memref<8x16xf32, #tpu.memory_space<vmem>>, vector<8x16xf32>
    %c0_1 = arith.constant 0 : index
    %c0_2 = arith.constant 0 : index
    %1 = vector.load %arg3[%c0_1, %c0_2] : memref<16x128xf32, #tpu.memory_space<vmem>>, vector<16x128xf32>
    %cst = arith.constant dense<0.000000e+00> : vector<8x128xf32>
    %2 = tpu.matmul %0, %1, %cst {dimension_numbers = #tpu.dot_dimension_numbers<[1], [0], [0], [1], [0, 0, 1, 1], [], []>} : vector<8x16xf32>, vector<16x128xf32>, vector<8x128xf32> -> vector<8x128xf32>
    %c0_3 = arith.constant 0 : index
    %c0_4 = arith.constant 0 : index
    %3 = vector.load %arg2[%c0_3, %c0_4] : memref<8x16xf32, #tpu.memory_space<vmem>>, vector<8x16xf32>
    %c0_5 = arith.constant 0 : index
    %c0_6 = arith.constant 0 : index
    %4 = vector.load %arg4[%c0_5, %c0_6] : memref<16x128xf32, #tpu.memory_space<vmem>>, vector<16x128xf32>
    %cst_7 = arith.constant dense<0.000000e+00> : vector<8x128xf32>
    %5 = tpu.matmul %3, %4, %cst_7 {dimension_numbers = #tpu.dot_dimension_numbers<[1], [0], [0], [1], [0, 0, 1, 1], [], []>} : vector<8x16xf32>, vector<16x128xf32>, vector<8x128xf32> -> vector<8x128xf32>
    %c0_8 = arith.constant 0 : index
    %c0_9 = arith.constant 0 : index
    %6 = vector.load %arg5[%c0_8, %c0_9] : memref<1x128xf32, #tpu.memory_space<vmem>>, vector<1x128xf32>
    %7 = vector.broadcast %6 : vector<1x128xf32> to vector<8x128xf32>
    %8 = arith.addf %2, %7 : vector<8x128xf32>
    %c0_10 = arith.constant 0 : index
    %c0_11 = arith.constant 0 : index
    %9 = vector.load %arg7[%c0_10, %c0_11] : memref<8x256xf32, #tpu.memory_space<vmem>>, vector<8x128xf32>
    tpu.vector_store %arg7[%c0_10, %c0_11], %8 {strides = array<i32>} : memref<8x256xf32, #tpu.memory_space<vmem>>, vector<8x128xf32>,
    %c0_12 = arith.constant 0 : index
    %c0_13 = arith.constant 0 : index
    %10 = vector.load %arg6[%c0_12, %c0_13] : memref<1x128xf32, #tpu.memory_space<vmem>>, vector<1x128xf32>
    %11 = vector.broadcast %10 : vector<1x128xf32> to vector<8x128xf32>
    %12 = arith.addf %5, %11 : vector<8x128xf32>
    %c0_14 = arith.constant 0 : index
    %c128 = arith.constant 128 : index
    %13 = vector.load %arg7[%c0_14, %c128] : memref<8x256xf32, #tpu.memory_space<vmem>>, vector<8x128xf32>
    tpu.vector_store %arg7[%c0_14, %c128], %12 {strides = array<i32>} : memref<8x256xf32, #tpu.memory_space<vmem>>, vector<8x128xf32>,
    return
  }
  func.func @transform_0(%arg0: i32) -> (i32, i32) {
    %c0_i32 = arith.constant 0 : i32
    %c0_i32_0 = arith.constant 0 : i32
    return %arg0, %c0_i32 : i32, i32
  }
  func.func @transform_1(%arg0: i32) -> (i32, i32) {
    %c0_i32 = arith.constant 0 : i32
    %c0_i32_0 = arith.constant 0 : i32
    return %arg0, %c0_i32 : i32, i32
  }
  func.func @transform_2(%arg0: i32) -> (i32, i32) {
    %c0_i32 = arith.constant 0 : i32
    %c0_i32_0 = arith.constant 0 : i32
    %c0_i32_1 = arith.constant 0 : i32
    return %c0_i32, %c0_i32_0 : i32, i32
  }
  func.func @transform_3(%arg0: i32) -> (i32, i32) {
    %c0_i32 = arith.constant 0 : i32
    %c0_i32_0 = arith.constant 0 : i32
    %c0_i32_1 = arith.constant 0 : i32
    return %c0_i32, %c0_i32_0 : i32, i32
  }
  func.func @transform_4(%arg0: i32) -> (i32, i32) {
    %c0_i32 = arith.constant 0 : i32
    %c0_i32_0 = arith.constant 0 : i32
    %c0_i32_1 = arith.constant 0 : i32
    return %c0_i32, %c0_i32_0 : i32, i32
  }
  func.func @transform_5(%arg0: i32) -> (i32, i32) {
    %c0_i32 = arith.constant 0 : i32
    %c0_i32_0 = arith.constant 0 : i32
    %c0_i32_1 = arith.constant 0 : i32
    return %c0_i32, %c0_i32_0 : i32, i32
  }
  func.func @transform_6(%arg0: i32) -> (i32, i32) {
    %c0_i32 = arith.constant 0 : i32
    %c0_i32_0 = arith.constant 0 : i32
    return %arg0, %c0_i32 : i32, i32
  }
}

</mosaic_0001>

<bundles_post_ra>
// kernel: graph_bert_positional_encoding.1
= control target key start
LH: loop header
LB: loop body
LE: loop exit
PB: predicated region body
PF: predicated region fallthrough
CT: control target
= control target key end

     0   :  { %v229_v0 = vmov 0.0|0.0   ;;  %vm230_vm0 = vmmov 0   ;;  %v231_v6 = vmov 0.0   ;;  %vm36_vm1 = vcmask 130048   ;;  %s297_s2 = inlined_call_operand.vmem [shape: f32[16,128], index: 2, kind: input, shape index: {}]   ;;  %s298_s3 = inlined_call_operand.vmem [shape: f32[16,128], index: 3, kind: input, shape index: {}]   ;;  %s299_s0 = inlined_call_operand.vmem [shape: f32[8,16], index: 0, kind: input, shape index: {}]   ;;  %s300_s1 = inlined_call_operand.vmem [shape: f32[8,16], index: 1, kind: input, shape index: {}]   ;;  %s301_s4 = inlined_call_operand.vmem [shape: f32[1,128], index: 4, kind: input, shape index: {}]   ;;  %s302_s5 = inlined_call_operand.vmem [shape: f32[1,128], index: 5, kind: input, shape index: {}]   ;;  %s303_s6 = inlined_call_operand.vmem [shape: f32[8,256], index: 6, kind: output, shape index: {}]  }
   0x1   :  { %220 = vmatprep.subr.bf16.mxu0 %v229_v0  ;;  %223 = vmatprep.subr.bf16.mxu1 %v229_v0  ;;  %v24_v1 = vld [vmem:[%s297_s2] sm:$0xff]  ;;  %v25_v2 = vld [vmem:[%s297_s2 + $0x8] sm:$0xff] }
   0x2   :  { %v27_v3 = vld [vmem:[%s298_s3] sm:$0xff]  ;;  %v221_v4 = vpack.c.bf16 %v25_v2, %v24_v1  ;;  %v28_v5 = vld [vmem:[%s298_s3 + $0x8] sm:$0xff]  ;;  %210 = vmatprep.mubr.msk.f32.mxu0 %vm230_vm0, %v231_v6  ;;  %217 = vmatprep.mubr.msk.f32.mxu1 %vm230_vm0, %v231_v6 }
   0x3   :  { %v224_v7 = vpack.c.bf16 %v28_v5, %v27_v3  ;;  %v23_v8 = vld [vmem:[%s299_s0] sm:$0xff] }
   0x4   :  { %222 = vmatpush3.bf16.msra.mxu0 %v221_v4  ;;  %v26_v9 = vld [vmem:[%s300_s1] sm:$0xff] }
   0x5   :  { %225 = vmatpush3.bf16.msra.mxu1 %v224_v7  ;;  %v196_v10 = vld [vmem:[%s301_s4] ss:$0 sm:$0xff] }
   0x6   :  { %v198_v11 = vld [vmem:[%s302_s5] ss:$0 sm:$0xff] }
   0x7   :  { %211 = vmatmul.mubr.msk.f32.vlgmr.msra.gmra.mrb[0].mxu0 %vm36_vm1, %v23_v8 }
   0x8   :  { %218 = vmatmul.mubr.msk.f32.vlgmr.msra.gmra.mrb[0].mxu1 %vm36_vm1, %v26_v9 }
  0xda   :  { %v106_v12 = vpop.f32.mrb[0].mxu0 }
  0xdb   :  { %v107_v13 = vadd.f32 %v196_v10, %v106_v12  ;;  %v187_v14 = vpop.f32.mrb[0].mxu1  ;;  %v212_v15 = vpop.f32.mrb[1].mxu0 }
  0xdc   :  { %v188_v16 = vadd.f32 %v198_v11, %v187_v14  ;;  %v219_v17 = vpop.f32.mrb[1].mxu1 }
  0xdd   :  { %110 = vst [vmem:[%s303_s6] sm:$0xff] %v107_v13 }
  0xde   :  { %191 = vst [vmem:[%s303_s6 + $0x8] sm:$0xff] %v188_v16 }

</bundles_post_ra>
